<compile_context>
chip_gen: v5e
topology: v5e:2x2
jax: 0.10.0
libtpu: 0.0.40
codegen_flags: <defaults>
</compile_context>

<pallas_src>
import functools

import jax
import jax.numpy as jnp
from jax.experimental import pallas as pl
from jax.experimental.pallas import tpu as pltpu


_TARGET_TILE_BYTES = 4 * 1024 * 1024   # per mel input, per pipeline buffer


def _round_up(x, m):
    return ((x + m - 1) // m) * m


def _num_tensorcores():
    """Best-effort TensorCore count of the local chip (v7x: 2, v5e/v6e: 1)."""
    try:
        info = pltpu.get_tpu_info()
        for name in ("num_tensorcores", "tensorcore_count", "num_cores",
                     "cores_per_chip"):
            v = getattr(info, name, None)
            if v:
                return max(1, int(v))
    except Exception:
        pass
    try:
        kind = jax.devices()[0].device_kind.lower()
        if "v7" in kind:
            return 2
    except Exception:
        pass
    return 1


def _tts_loss_kernel(mel_out_ref, mel_tgt_ref, stop_pred_ref, stop_tgt_ref,
                     out_ref, acc_ref, *, steps, rows_per_block, n_rows,
                     needs_mask):
    c = pl.program_id(0)                 # core-split axis
    i = pl.program_id(1)                 # row-block / reduction axis ("arbitrary")
    last = pl.num_programs(1) - 1

    # ---- streaming MSE partial: cast in-kernel, sublane-reduced accumulate --
    a = mel_out_ref[...].astype(jnp.float32)
    b = mel_tgt_ref[...].astype(jnp.float32)
    d = a - b
    if needs_mask:  # static: only emitted when the grid over-covers the rows
        row_start = (c * steps + i) * rows_per_block
        rid = row_start + jax.lax.broadcasted_iota(jnp.int32, d.shape, 0)
        d = jnp.where(rid < n_rows, d, 0.0)
    partial = jnp.sum(d * d, axis=0, keepdims=True)        # (1, lanes) f32

    @pl.when(i == 0)
    def _init():
        acc_ref[...] = partial            # write, no zero-fill + add

    @pl.when(i != 0)
    def _accum():
        acc_ref[...] += partial

    # ---- epilogue: one tiny cross-lane reduce + masked-free BCE ------------
    @pl.when(i == last)
    def _finalize():
        mel_sq_sum = jnp.sum(acc_ref[...])
        lane = jax.lax.broadcasted_iota(jnp.int32, out_ref.shape, 2)
        out_ref[...] = jnp.where(lane == 0, mel_sq_sum, 0.0)

        @pl.when(c == 0)                  # only one core slice does the stop term
        def _stop():
            x = stop_pred_ref[...].astype(jnp.float32)
            z = stop_tgt_ref[...].astype(jnp.float32)
            # Numerically stable BCE-with-logits: max(x,0) - x*z + log1p(exp(-|x|))
            bce = jnp.maximum(x, 0.0) - x * z + jnp.log1p(jnp.exp(-jnp.abs(x)))
            stop_sum = jnp.sum(bce)
            out_ref[...] = jnp.where(lane == 0, mel_sq_sum,
                                     jnp.where(lane == 1, stop_sum, 0.0))


def transformer_tts_loss(mel_outputs, mel_targets, stop_preds, stop_targets):
    """Returns (total_loss, mel_loss, stop_loss) as float32 scalars."""
    assert mel_outputs.shape == mel_targets.shape
    assert stop_preds.shape == stop_targets.shape

    n_mel = int(mel_outputs.size)
    n_stop = int(stop_preds.size)

    # ---- zero-copy lane layout for the mel tensors -------------------------
    # Widest lane count that exactly divides n_mel -> pure (free) reshape of
    # contiguous data; otherwise the natural [B*T, D] view (full-extent lanes).
    last_dim = int(mel_outputs.shape[-1]) if mel_outputs.ndim else 1
    lanes = None
    for cand in (512, 256, 128):
        if n_mel % cand == 0:
            lanes = cand
            break
    if lanes is None:
        lanes = max(1, last_dim)
    n_rows = n_mel // lanes

    mel_o = mel_outputs.reshape(n_rows, lanes)
    mel_t = mel_targets.reshape(n_rows, lanes)

    # Stop tensors: tiny full-extent blocks, resident across the whole grid.
    stop_p = stop_preds.reshape(1, n_stop)
    stop_t = stop_targets.astype(jnp.float32).reshape(1, n_stop)   # mirrors .float()

    # ---- tiling -------------------------------------------------------------
    itemsize = min(mel_outputs.dtype.itemsize, mel_targets.dtype.itemsize)
    pack = 32 // itemsize                    # sublane pack: 8 f32 / 16 bf16 / 32 int8
    if n_rows < pack:
        rows_per_block = max(1, n_rows)      # full-extent row block (tiny inputs)
    else:
        target_rows = max(pack,
                          (_TARGET_TILE_BYTES // (lanes * itemsize)) // pack * pack)
        rows_per_block = min(target_rows, (n_rows // pack) * pack)
    n_blocks = -(-n_rows // rows_per_block)

    core_split = min(_num_tensorcores(), n_blocks)
    steps = -(-n_blocks // core_split)
    # Mask only if the grid over-covers the rows (tail block and/or clamped
    # extra blocks from the core split) -- static switch.
    needs_mask = (core_split * steps * rows_per_block) != n_rows

    def mel_index(c, i):
        # Clamp so over-coverage blocks re-read the last valid block (their
        # contribution is fully masked out in-kernel) instead of going OOB.
        return (jnp.minimum(c * steps + i, n_blocks - 1), 0)

    mel_spec = pl.BlockSpec((rows_per_block, lanes), mel_index)
    stop_spec = pl.BlockSpec((1, n_stop), lambda c, i: (0, 0))

    if core_split > 1:
        dim_sem = (getattr(pltpu, "CORE_PARALLEL", "parallel"),
                   getattr(pltpu, "ARBITRARY", "arbitrary"))
    else:
        dim_sem = ("arbitrary", "arbitrary")

    kernel = functools.partial(
        _tts_loss_kernel, steps=steps, rows_per_block=rows_per_block,
        n_rows=n_rows, needs_mask=needs_mask)

    partials = pl.pallas_call(
        kernel,
        out_shape=jax.ShapeDtypeStruct((core_split, 8, 128), jnp.float32),
        grid_spec=pltpu.PrefetchScalarGridSpec(
            num_scalar_prefetch=0,
            grid=(core_split, steps),
            in_specs=[mel_spec, mel_spec, stop_spec, stop_spec],
            out_specs=pl.BlockSpec((1, 8, 128), lambda c, i: (c, 0, 0)),
            scratch_shapes=[pltpu.VMEM((1, lanes), jnp.float32)],
        ),
        compiler_params=pltpu.CompilerParams(
            dimension_semantics=dim_sem,
            vmem_limit_bytes=32 * 1024 * 1024,
        ),
        cost_estimate=pl.CostEstimate(
            flops=3 * n_mel + 8 * n_stop,
            transcendentals=2 * n_stop,
            bytes_accessed=(mel_outputs.dtype.itemsize
                            + mel_targets.dtype.itemsize) * n_mel
                           + 8 * n_stop + core_split * 8 * 128 * 4),
    )(mel_o, mel_t, stop_p, stop_t)

    mel_loss = jnp.sum(partials[:, 0, 0]) / n_mel
    stop_loss = jnp.sum(partials[:, 0, 1]) / n_stop
    total_loss = mel_loss + stop_loss
    return total_loss, mel_loss, stop_loss


if __name__ == "__main__":
    key = jax.random.PRNGKey(0)
    k1, k2, k3, k4 = jax.random.split(key, 4)

    B, T, D = 2, 8, 32  # batch_size, mel_len, mel_dim
    mel_outputs = jax.random.normal(k1, (B, T, D), jnp.float32)
    mel_targets = jax.random.normal(k2, (B, T, D), jnp.float32)
    stop_preds = jax.random.normal(k3, (B, T), jnp.float32)
    stop_targets = (jax.random.uniform(k4, (B, T)) > 0.5).astype(jnp.float32)

    total, mel_l, stop_l = transformer_tts_loss(
        mel_outputs, mel_targets, stop_preds, stop_targets)
    jax.block_until_ready((total, mel_l, stop_l))

    # Pure-JAX reference (same semantics as the PyTorch module).
    ref_mel = jnp.mean((mel_outputs - mel_targets) ** 2)
    x, z = stop_preds, stop_targets
    ref_stop = jnp.mean(jnp.maximum(x, 0.0) - x * z + jnp.log1p(jnp.exp(-jnp.abs(x))))
    ref_total = ref_mel + ref_stop
    assert jnp.allclose(mel_l, ref_mel, atol=1e-5), (mel_l, ref_mel)
    assert jnp.allclose(stop_l, ref_stop, atol=1e-5), (stop_l, ref_stop)
    assert jnp.allclose(total, ref_total, atol=1e-5), (total, ref_total)

    print("KERNEL_OK")
</pallas_src>

<mosaic_0001>
module attributes {stable_mosaic.version = 11 : i64} {
  func.func @_tts_loss_kernel(%arg0: i32, %arg1: i32, %arg2: memref<1x512xf32, #tpu.memory_space<vmem>>, %arg3: memref<1x512xf32, #tpu.memory_space<vmem>>, %arg4: memref<1x16xf32, #tpu.memory_space<vmem>>, %arg5: memref<1x16xf32, #tpu.memory_space<vmem>>, %arg6: memref<1x8x128xf32, #tpu.memory_space<vmem>>, %arg7: memref<1x512xf32, #tpu.memory_space<vmem>>) attributes {dimension_semantics = [#tpu.dimension_semantics<arbitrary>, #tpu.dimension_semantics<arbitrary>], iteration_bounds = array<i64: 1, 1>, scalar_prefetch = 0 : i64, scratch_operands = 1 : i64, tpu.core_type = #tpu.core_type<tc>, window_params = [{transform_indices = @transform_0, window_bounds = array<i64: 1, 512>}, {transform_indices = @transform_1, window_bounds = array<i64: 1, 512>}, {pipeline_mode = #tpu.pipeline_mode<synchronous>, transform_indices = @transform_2, window_bounds = array<i64: 1, 16>}, {pipeline_mode = #tpu.pipeline_mode<synchronous>, transform_indices = @transform_3, window_bounds = array<i64: 1, 16>}, {transform_indices = @transform_4, window_bounds = array<i64: 1, 8, 128>}]} {
    %c0 = arith.constant 0 : index
    %c0_0 = arith.constant 0 : index
    %0 = vector.load %arg2[%c0, %c0_0] : memref<1x512xf32, #tpu.memory_space<vmem>>, vector<1x512xf32>
    %c0_1 = arith.constant 0 : index
    %c0_2 = arith.constant 0 : index
    %1 = vector.load %arg3[%c0_1, %c0_2] : memref<1x512xf32, #tpu.memory_space<vmem>>, vector<1x512xf32>
    %2 = arith.subf %0, %1 : vector<1x512xf32>
    %3 = arith.mulf %2, %2 : vector<1x512xf32>
    %cst = arith.constant dense<0.000000e+00> : vector<512xf32>
    %4 = vector.multi_reduction <add>, %3, %cst [0] : vector<1x512xf32> to vector<512xf32>
    %5 = vector.shape_cast %4 : vector<512xf32> to vector<1x512xf32>
    %c0_i32 = arith.constant 0 : i32
    %6 = arith.cmpi eq, %arg1, %c0_i32 : i32
    %7 = arith.extui %6 : i1 to i32
    %c0_i32_3 = arith.constant 0 : i32
    %8 = arith.cmpi ne, %7, %c0_i32_3 : i32
    scf.if %8 {
      %c0_8 = arith.constant 0 : index
      %c0_9 = arith.constant 0 : index
      %15 = vector.load %arg7[%c0_8, %c0_9] : memref<1x512xf32, #tpu.memory_space<vmem>>, vector<1x512xf32>
      tpu.vector_store %arg7[%c0_8, %c0_9], %5 {strides = array<i32>} : memref<1x512xf32, #tpu.memory_space<vmem>>, vector<1x512xf32>,
    } else {
    }
    %c0_i32_4 = arith.constant 0 : i32
    %9 = arith.cmpi ne, %arg1, %c0_i32_4 : i32
    %10 = arith.extui %9 : i1 to i32
    %c0_i32_5 = arith.constant 0 : i32
    %11 = arith.cmpi ne, %10, %c0_i32_5 : i32
    scf.if %11 {
      %c0_8 = arith.constant 0 : index
      %c0_9 = arith.constant 0 : index
      %15 = vector.load %arg7[%c0_8, %c0_9] : memref<1x512xf32, #tpu.memory_space<vmem>>, vector<1x512xf32>
      %16 = arith.addf %15, %5 : vector<1x512xf32>
      %c0_10 = arith.constant 0 : index
      %c0_11 = arith.constant 0 : index
      %17 = vector.load %arg7[%c0_10, %c0_11] : memref<1x512xf32, #tpu.memory_space<vmem>>, vector<1x512xf32>
      tpu.vector_store %arg7[%c0_10, %c0_11], %16 {strides = array<i32>} : memref<1x512xf32, #tpu.memory_space<vmem>>, vector<1x512xf32>,
    } else {
    }
    %c0_i32_6 = arith.constant 0 : i32
    %12 = arith.cmpi eq, %arg1, %c0_i32_6 : i32
    %13 = arith.extui %12 : i1 to i32
    %c0_i32_7 = arith.constant 0 : i32
    %14 = arith.cmpi ne, %13, %c0_i32_7 : i32
    scf.if %14 {
      %c0_8 = arith.constant 0 : index
      %c0_9 = arith.constant 0 : index
      %15 = vector.load %arg7[%c0_8, %c0_9] : memref<1x512xf32, #tpu.memory_space<vmem>>, vector<1x512xf32>
      %16 = vector.shape_cast %15 : vector<1x512xf32> to vector<1x1x512xf32>
      %cst_10 = arith.constant dense<0.000000e+00> : vector<1xf32>
      %17 = vector.multi_reduction <add>, %16, %cst_10 [1, 2] : vector<1x1x512xf32> to vector<1xf32>
      %18 = vector.shape_cast %17 : vector<1xf32> to vector<1x1x1xf32>
      %19 = vector.extract %18[0, 0, 0] : f32 from vector<1x1x1xf32>
      %20 = tpu.iota {dimensions = array<i32: 2>} : vector<1x8x128xi32>
      %c0_i32_11 = arith.constant 0 : i32
      %21 = vector.broadcast %c0_i32_11 : i32 to vector<1x8x128xi32>
      %22 = arith.cmpi eq, %20, %21 : vector<1x8x128xi32>
      %cst_12 = arith.constant 0.000000e+00 : f32
      %23 = vector.broadcast %19 : f32 to vector<1x8x128xf32>
      %24 = vector.broadcast %cst_12 : f32 to vector<1x8x128xf32>
      %25 = arith.select %22, %23, %24 : vector<1x8x128xi1>, vector<1x8x128xf32>
      %c0_13 = arith.constant 0 : index
      %c0_14 = arith.constant 0 : index
      %c0_15 = arith.constant 0 : index
      %26 = vector.load %arg6[%c0_13, %c0_14, %c0_15] : memref<1x8x128xf32, #tpu.memory_space<vmem>>, vector<1x8x128xf32>
      tpu.vector_store %arg6[%c0_13, %c0_14, %c0_15], %25 {strides = array<i32>} : memref<1x8x128xf32, #tpu.memory_space<vmem>>, vector<1x8x128xf32>,
      %c0_i32_16 = arith.constant 0 : i32
      %27 = arith.cmpi eq, %arg0, %c0_i32_16 : i32
      %28 = arith.extui %27 : i1 to i32
      %c0_i32_17 = arith.constant 0 : i32
      %29 = arith.cmpi ne, %28, %c0_i32_17 : i32
      scf.if %29 {
        %c0_18 = arith.constant 0 : index
        %c0_19 = arith.constant 0 : index
        %30 = vector.load %arg4[%c0_18, %c0_19] : memref<1x16xf32, #tpu.memory_space<vmem>>, vector<1x16xf32>
        %c0_20 = arith.constant 0 : index
        %c0_21 = arith.constant 0 : index
        %31 = vector.load %arg5[%c0_20, %c0_21] : memref<1x16xf32, #tpu.memory_space<vmem>>, vector<1x16xf32>
        %cst_22 = arith.constant 0.000000e+00 : f32
        %32 = vector.broadcast %cst_22 : f32 to vector<1x16xf32>
        %33 = arith.maximumf %30, %32 : vector<1x16xf32>
        %34 = arith.mulf %30, %31 : vector<1x16xf32>
        %35 = arith.subf %33, %34 : vector<1x16xf32>
        %36 = math.absf %30 : vector<1x16xf32>
        %cst_23 = arith.constant 0.000000e+00 : f32
        %37 = vector.broadcast %cst_23 : f32 to vector<1x16xf32>
        %38 = arith.subf %37, %36 : vector<1x16xf32>
        %39 = math.exp %38 : vector<1x16xf32>
        %40 = math.log1p %39 : vector<1x16xf32>
        %41 = arith.addf %35, %40 : vector<1x16xf32>
        %42 = vector.shape_cast %41 : vector<1x16xf32> to vector<1x1x16xf32>
        %cst_24 = arith.constant dense<0.000000e+00> : vector<1xf32>
        %43 = vector.multi_reduction <add>, %42, %cst_24 [1, 2] : vector<1x1x16xf32> to vector<1xf32>
        %44 = vector.shape_cast %43 : vector<1xf32> to vector<1x1x1xf32>
        %45 = vector.extract %44[0, 0, 0] : f32 from vector<1x1x1xf32>
        %c0_i32_25 = arith.constant 0 : i32
        %46 = vector.broadcast %c0_i32_25 : i32 to vector<1x8x128xi32>
        %47 = arith.cmpi eq, %20, %46 : vector<1x8x128xi32>
        %c1_i32 = arith.constant 1 : i32
        %48 = vector.broadcast %c1_i32 : i32 to vector<1x8x128xi32>
        %49 = arith.cmpi eq, %20, %48 : vector<1x8x128xi32>
        %cst_26 = arith.constant 0.000000e+00 : f32
        %50 = vector.broadcast %45 : f32 to vector<1x8x128xf32>
        %51 = vector.broadcast %cst_26 : f32 to vector<1x8x128xf32>
        %52 = arith.select %49, %50, %51 : vector<1x8x128xi1>, vector<1x8x128xf32>
        %53 = vector.broadcast %19 : f32 to vector<1x8x128xf32>
        %54 = arith.select %47, %53, %52 : vector<1x8x128xi1>, vector<1x8x128xf32>
        %c0_27 = arith.constant 0 : index
        %c0_28 = arith.constant 0 : index
        %c0_29 = arith.constant 0 : index
        %55 = vector.load %arg6[%c0_27, %c0_28, %c0_29] : memref<1x8x128xf32, #tpu.memory_space<vmem>>, vector<1x8x128xf32>
        tpu.vector_store %arg6[%c0_27, %c0_28, %c0_29], %54 {strides = array<i32>} : memref<1x8x128xf32, #tpu.memory_space<vmem>>, vector<1x8x128xf32>,
      } else {
      }
    } else {
    }
    return
  }
  func.func @transform_0(%arg0: i32, %arg1: i32) -> (i32, i32) {
    %c1_i32 = arith.constant 1 : i32
    %0 = arith.muli %arg0, %c1_i32 : i32
    %1 = arith.addi %0, %arg1 : i32
    %c0_i32 = arith.constant 0 : i32
    %2 = arith.minsi %1, %c0_i32 : i32
    %c0_i32_0 = arith.constant 0 : i32
    %c0_i32_1 = arith.constant 0 : i32
    return %2, %c0_i32_0 : i32, i32
  }
  func.func @transform_1(%arg0: i32, %arg1: i32) -> (i32, i32) {
    %c1_i32 = arith.constant 1 : i32
    %0 = arith.muli %arg0, %c1_i32 : i32
    %1 = arith.addi %0, %arg1 : i32
    %c0_i32 = arith.constant 0 : i32
    %2 = arith.minsi %1, %c0_i32 : i32
    %c0_i32_0 = arith.constant 0 : i32
    %c0_i32_1 = arith.constant 0 : i32
    return %2, %c0_i32_0 : i32, i32
  }
  func.func @transform_2(%arg0: i32, %arg1: i32) -> (i32, i32) {
    %c0_i32 = arith.constant 0 : i32
    %c0_i32_0 = arith.constant 0 : i32
    %c0_i32_1 = arith.constant 0 : i32
    return %c0_i32, %c0_i32_0 : i32, i32
  }
  func.func @transform_3(%arg0: i32, %arg1: i32) -> (i32, i32) {
    %c0_i32 = arith.constant 0 : i32
    %c0_i32_0 = arith.constant 0 : i32
    %c0_i32_1 = arith.constant 0 : i32
    return %c0_i32, %c0_i32_0 : i32, i32
  }
  func.func @transform_4(%arg0: i32, %arg1: i32) -> (i32, i32, i32) {
    %c0_i32 = arith.constant 0 : i32
    %c0_i32_0 = arith.constant 0 : i32
    %c0_i32_1 = arith.constant 0 : i32
    return %arg0, %c0_i32, %c0_i32_0 : i32, i32, i32
  }
}

</mosaic_0001>

<bundles_post_ra>
// kernel: tpu_custom_call.1
= control target key start
LH: loop header
LB: loop body
LE: loop exit
PB: predicated region body
PF: predicated region fallthrough
CT: control target
= control target key end

     0   :  { %9 = vsyncpa [#allocation4], 0  ;;  %s316_s0 = inlined_call_operand.hbm [shape: f32[1,512], index: 0, kind: input, shape index: {}]   ;;  %s317_s1 = inlined_call_operand.hbm [shape: f32[1,512], index: 1, kind: input, shape index: {}]   ;;  %s318_s2 = inlined_call_operand.vmem [shape: f32[1,16], index: 2, kind: input, shape index: {}]   ;;  %s319_s3 = inlined_call_operand.vmem [shape: f32[1,16], index: 3, kind: input, shape index: {}]   ;;  %s320_s4 = inlined_call_operand.hbm [shape: f32[1,8,128], index: 4, kind: output, shape index: {}]  }
   0x1   :  { %10 = vsyncpa [#allocation7], 0 }
   0x2   :  { %11 = vsyncpa [#allocation5], 0  ;;  %s22_s17 = sshll.u32 %s316_s0, 4  ;;  %s273_s18 = smov [#allocation3]   ;;  %s23_s17 = int_to_ptr.hbm [resolvable:$true] %s22_s17 }
   0x3   :  { %s24_s19 = sshll.u32 %s273_s18, 4  ;;  %s38_s22 = sshll.u32 %s317_s1, 4  ;;  %s25_s19 = int_to_ptr.vmem [resolvable:$true] %s24_s19  ;;  %s39_s22 = int_to_ptr.hbm [resolvable:$true] %s38_s22 }
   0x4   :  { %27 = dma.hbm_to_vmem [thread:$0]  %s23_s17, 64, %s25_s19, [#allocation4]  }
   0x5   :  { %s274_s23 = smov [#allocation6]  }
   0x6   :  { %s40_s24 = sshll.u32 %s274_s23, 4  ;;  %s41_s24 = int_to_ptr.vmem [resolvable:$true] %s40_s24 }
   0x7   :  { %43 = dma.hbm_to_vmem [thread:$0]  %s39_s22, 64, %s41_s24, [#allocation7]  }
   0x8   :  { %267 = dma.done.wait [#allocation4], 64  }
   0x9   :  { %268 = vsyncadd [#allocation4], 4294967232 }
   0xa   :  { %269 = dma.done.wait [#allocation7], 64  }
   0xb   :  { %270 = vsyncadd [#allocation7], 4294967232  ;;  %v71_v0 = vlaneseq  ;;  %v62_v1 = vld [vmem:[#allocation3] sm:$0xf]  ;;  %v63_v2 = vld [vmem:[#allocation6] sm:$0xf] }
   0xc   :  { %v127_v3 = vld [vmem:[%s318_s2] sm:$0x1]  ;;  %v64_v4 = vsub.f32 %v62_v1, %v63_v2  ;;  %vm100_vm1 = vcmask 1040384   ;;  %vm146_vm3 = vcmask 122880   ;;  %s169_s30 = sshll.u32 %s320_s4, 4  ;;  %s170_s30 = int_to_ptr.hbm [resolvable:$true] %s169_s30 }
   0xd   :  { %v132_v5 = vand.u32 2147483647, %v127_v3  ;;  %vm73_vm0 = vcmp.lt.s32.totalorder %v71_v0, 512  ;;  %v128_v20 = vld [vmem:[%s319_s3] sm:$0x1]  ;;  %v129_v25 = vmax.f32 %v127_v3, 0.0 }
   0xe   :  { %v65_v6 = vmul.f32 %v64_v4, %v64_v4  ;;  %v130_v26 = vmul.f32 %v128_v20, %v127_v3  ;;  %v118_v50 = vand.u32 127, %v71_v0  ;;  %s275_s3 = smov [#allocation8]  }
   0xf   :  { %v133_v7 = vsub.f32 0.0, %v132_v5  ;;  %s167_s26 = sshll.u32 %s275_s3, 4  ;;  %s168_s26 = int_to_ptr.vmem [resolvable:$true] %s167_s26 }
  0x10   :  { %75 = vst.msk [vmem:[#allocation2] sm:$0xf] %vm73_vm0, %v65_v6  ;;  %v131_v31 = vsub.f32 %v129_v25, %v130_v26  ;;  %vm157_vm4 = vcmp.eq.s32.totalorder %v118_v50, 1  ;;  %vm119_vm5 = vcmp.eq.s32.totalorder %v118_v50, 0 }
  0x11   :  { %v134_v8 = vmul.f32 1.442695, %v133_v7 }
  0x13   :  { %191 = vpow2.f32 %v134_v8 }
  0x17   :  { %v90_v9 = vld [vmem:[#allocation2] sm:$0xf] }
  0x18   :  { %v92_v11 = vperm.slane %v90_v9, 0  ;;  %v93_v12 = vperm.slane %v90_v9, 1  ;;  %v94_v13 = vperm.slane %v90_v9, 2  ;;  %v95_v14 = vperm.slane %v90_v9, 3 }
  0x19   :  { %v192_v10 = vpop.eup %191 }
  0x1a   :  { %v136_v15 = vadd.f32 1.0, %v192_v10  ;;  %v139_v16 = vmul.f32 -0.5, %v192_v10  ;;  %v101_v17 = vsel %vm100_vm1, %v92_v11, 0.0  ;;  %v102_v18 = vsel %vm100_vm1, %v93_v12, 0.0 }
  0x1b   :  { %v104_v19 = vsel %vm100_vm1, %v94_v13, 0.0  ;;  %v103_v21 = vadd.f32 %v102_v18, %v101_v17  ;;  %v106_v22 = vsel %vm100_vm1, %v95_v14, 0.0  ;;  %v142_v27 = vand.u32 2147483647, %v192_v10 }
  0x1c   :  { %193 = vlog2.f32 %v136_v15  ;;  %v140_v23 = vadd.f32 1.0, %v139_v16 }
  0x1d   :  { %v105_v24 = vadd.f32 %v104_v19, %v103_v21  ;;  %vm143_vm2 = vcmp.lt.f32.partialorder %v142_v27, 0.0004427343 }
  0x1e   :  { %v141_v29 = vmul.f32 %v192_v10, %v140_v23 }
  0x1f   :  { %v107_v28 = vadd.f32 %v106_v22, %v105_v24 }
  0x21   :  { %108 = vadd.xlane.f32.xlu0 %v107_v28 }
  0x22   :  { %v194_v30 = vpop.eup %193 }
  0x23   :  { %v138_v32 = vmul.f32 0.6931472, %v194_v30 }
  0x25   :  { %v144_v33 = vsel %vm143_vm2, %v141_v29, %v138_v32 }
  0x26   :  { %v145_v34 = vadd.f32 %v144_v33, %v131_v31 }
  0x28   :  { %v147_v35 = vsel %vm146_vm3, %v145_v34, 0.0 }
  0x29   :  { %148 = vadd.xlane.f32.xlu0 %v147_v35 }
  0x94   :  { %v109_v36 = vpop.xlane.xlu0 %108 }
  0x95   :  { %v110_v37 = vrot.slane %v109_v36, 4 }
  0x97   :  { %v111_v38 = vadd.f32 %v110_v37, %v109_v36 }
  0x99   :  { %v112_v39 = vrot.slane %v111_v38, 2 }
  0x9b   :  { %v113_v40 = vadd.f32 %v112_v39, %v111_v38 }
  0x9c   :  { %v149_v41 = vpop.xlane.xlu0 %148 }
  0x9d   :  { %v150_v42 = vrot.slane %v149_v41, 4  ;;  %v114_v43 = vrot.slane %v113_v40, 1 }
  0x9f   :  { %v151_v44 = vadd.f32 %v150_v42, %v149_v41  ;;  %v115_v45 = vadd.f32 %v114_v43, %v113_v40 }
  0xa1   :  { %v152_v46 = vrot.slane %v151_v44, 2  ;;  %184 = vpush %v115_v45 }
  0xa3   :  { %v153_v47 = vadd.f32 %v152_v46, %v151_v44 }
  0xa5   :  { %v154_v48 = vrot.slane %v153_v47, 1 }
  0xa7   :  { %v155_v49 = vadd.f32 %v154_v48, %v153_v47 }
  0xa9   :  { %186 = vpush %v155_v49 }
  0xd2   :  { %s185_s27 = spop %184 }
  0xd3   :  { %v120_v52 = vstv %s185_s27 }
  0xda   :  { %s187_s5 = spop %186 }
  0xdb   :  { %v158_v51 = vstv %s187_s5 }
  0xdc   :  { %v159_v53 = vsel %vm157_vm4, %v158_v51, 0.0 }
  0xdd   :  { %v160_v54 = vsel %vm119_vm5, %v120_v52, %v159_v53 }
  0xde   :  { %161 = vst [vmem:[#allocation8] sm:$0xff] %v160_v54 }
  0xdf   :  { %172 = dma.vmem_to_hbm [thread:$0]  %s168_s26, 128, %s170_s30, [#allocation5]  }
  0xe0   :  { %271 = dma.done.wait [#allocation5], 128  }
  0xe1   :  { %272 = vsyncadd [#allocation5], 4294967168 }
  0xe2   :  { %177 = vsyncpa [#allocation4], 1 }
  0xe3   :  { %178 = vsyncpa [#allocation7], 1 }
  0xe4   :  { %179 = vsyncpa [#allocation5], 1 }

</bundles_post_ra>
